<compile_context>
chip_gen: v6e
topology: v6e:2x2x1
jax: 0.10.0
libtpu: 0.0.40
codegen_flags: <defaults>
</compile_context>

<pallas_src>
import functools

import numpy as np
import jax
import jax.numpy as jnp
from jax import lax
from jax.experimental import pallas as pl
from jax.experimental.pallas import tpu as pltpu

_NUM_LEVELS = 9   # k = 3..11
_N_ACC = 4        # partial accumulators to break the VALU add-latency chain


def _cost_volume_kernel(x_ref, y_ref, o_ref, *, channels, attack):
    # x_ref, y_ref: (C, block_h, W) for one (batch, h-tile); resident across i.
    # o_ref:        (9, block_h, W) for one (batch, disparity, h-tile).
    i = pl.program_id(2)                      # disparity index
    C, H, W = x_ref.shape

    col = lax.broadcasted_iota(jnp.int32, (H, W), 1)
    valid = col >= i                          # columns [0, i) -> 0 (zero-init semantics)

    # Channel-prefix boundaries for the 9 "k" levels, clamped like torch slicing.
    bounds = [min(k * k, channels) for k in range(3, 12)]

    # Four partial prefix sums over channels (combined at each level boundary).
    accs = [jnp.zeros((H, W), jnp.float32) for _ in range(_N_ACC)]
    prev = 0
    cnt = 0
    for li, b in enumerate(bounds):
        # Statically unrolled channel segment [prev, b): per-channel loads keep
        # vreg pressure low; multiple accumulators fill the 4 VALU slots.
        for c in range(prev, b):
            xc = x_ref[c]
            # y shifted right by i along W: y_sh[.., w] = y[.., w - i]
            # (XLU rotate; wrapped columns w < i are masked out below).
            yc = pltpu.roll(y_ref[c], i, axis=1)
            if attack:
                d = jnp.abs(xc.astype(jnp.float32) - yc.astype(jnp.float32))
            else:
                d = (xc != yc).astype(jnp.float32)
            accs[cnt % _N_ACC] = accs[cnt % _N_ACC] + d
            cnt += 1
        prev = b

        running = (accs[0] + accs[1]) + (accs[2] + accs[3])
        denom = float(b) if b > 0 else 1.0    # torch.mean divides by clamped count
        level = jnp.where(valid, running * (1.0 / denom), 0.0)
        o_ref[li, :, :] = level.astype(o_ref.dtype)


def _vmem_need_bytes(C, W, block_h, in_itemsize, out_itemsize):
    in_block = C * block_h * W * in_itemsize
    out_block = _NUM_LEVELS * block_h * W * out_itemsize
    # Elementwise temporaries Mosaic materializes in VMEM per step:
    # xc, yc, rolled yc, diff, 4 partial accumulators, running, level ~ 10 f32 tiles.
    temps = 10 * block_h * W * 4
    # 2 inputs x 2 pipeline buffers + 2 output buffers.
    return 2 * 2 * in_block + 2 * out_block + temps


def get_cost_volume(x, y, maxdisp, attack=False, *, block_h=None, out_dtype=None):
    """Cost volume (N, 9, maxdisp, H, W).

    out_dtype defaults to bfloat16 (the kernel is HBM-writeback bound on
    v5e/v6e; bf16 halves the dominant output traffic). Pass jnp.float32 for
    bit-exact parity with the float32 PyTorch reference.
    """
    if out_dtype is None:
        out_dtype = jnp.bfloat16

    N, C, H, W = x.shape
    assert y.shape == x.shape

    # Keep every output store lane-dense: pad W to a multiple of 128, crop after.
    Wp = ((W + 127) // 128) * 128
    if Wp != W:
        pad = ((0, 0), (0, 0), (0, 0), (0, Wp - W))
        x = jnp.pad(x, pad)
        y = jnp.pad(y, pad)

    in_itemsize = jnp.dtype(x.dtype).itemsize
    out_itemsize = jnp.dtype(out_dtype).itemsize

    # Per-generation VMEM budget (~48 MiB on v7x, ~96 MiB on v5e/v6e).
    try:
        vmem_cap = int(pltpu.get_tpu_info().vmem_capacity_bytes)
    except Exception:                          # conservative fallback
        vmem_cap = 64 << 20
    budget = (vmem_cap * 3) // 4
    slack = 2 << 20

    if block_h is None:
        # Largest sublane-aligned block_h (up to full H) whose working set fits.
        cands = sorted({H} | {h for h in range(8, H + 1, 8) if H % h == 0},
                       reverse=True)
        block_h = cands[-1]
        for h in cands:
            if _vmem_need_bytes(C, Wp, h, in_itemsize, out_itemsize) + slack <= budget:
                block_h = h
                break
    assert H % block_h == 0, "block_h must divide H"
    assert block_h == H or block_h % 8 == 0, "H tile must be sublane-aligned"

    needed = _vmem_need_bytes(C, Wp, block_h, in_itemsize, out_itemsize) + slack
    # Never set the scoped limit below what the blocks actually need.
    vmem_limit = int(min(max(needed, budget), vmem_cap - (2 << 20)))

    kernel = functools.partial(_cost_volume_kernel, channels=C, attack=attack)

    cost_est = pl.CostEstimate(
        flops=3 * N * maxdisp * C * H * Wp,     # compare/abs + convert + accumulate
        transcendentals=0,
        bytes_accessed=2 * N * C * H * Wp * in_itemsize
        + N * _NUM_LEVELS * maxdisp * H * Wp * out_itemsize,
    )

    nh = H // block_h
    grid = (N, nh, maxdisp)   # disparity innermost: x/y blocks stay VMEM-resident

    out = pl.pallas_call(
        kernel,
        out_shape=jax.ShapeDtypeStruct((N, _NUM_LEVELS, maxdisp, H, Wp), out_dtype),
        grid_spec=pltpu.PrefetchScalarGridSpec(
            num_scalar_prefetch=0,
            grid=grid,
            in_specs=[
                pl.BlockSpec((None, C, block_h, Wp), lambda n, h, i: (n, 0, h, 0)),
                pl.BlockSpec((None, C, block_h, Wp), lambda n, h, i: (n, 0, h, 0)),
            ],
            out_specs=pl.BlockSpec(
                (None, _NUM_LEVELS, None, block_h, Wp),
                lambda n, h, i: (n, 0, i, h, 0),
            ),
        ),
        compiler_params=pltpu.CompilerParams(
            # Megacore split on N/H only; keep all disparities of a tile on one
            # core so the x/y blocks stay resident across the inner axis.
            dimension_semantics=("parallel", "parallel", "arbitrary"),
            vmem_limit_bytes=vmem_limit,
        ),
        cost_estimate=cost_est,
    )(x, y)

    if Wp != W:
        out = out[..., :W]
    return out


def _reference(x, y, maxdisp, attack=False):
    xn = np.asarray(x, dtype=np.float32)
    yn = np.asarray(y, dtype=np.float32)
    N, C, H, W = xn.shape
    cost = np.zeros((N, 9, maxdisp, H, W), np.float32)
    for i in range(maxdisp):
        for k in range(3, 12):
            idx = min(k * k, C)
            xs = xn[:, :idx, :, i:]
            ys = yn[:, :idx, :, : W - i]
            if attack:
                cost[:, k - 3, i, :, i:] = np.mean(np.abs(xs - ys), axis=1)
            else:
                cost[:, k - 3, i, :, i:] = np.mean(
                    (xs != ys).astype(np.float32), axis=1
                )
    return cost


if __name__ == "__main__":
    # GetCostVolume has no learned parameters; only the maxdisp hyperparameter.
    N, C, H, W = 2, 16, 16, 128
    maxdisp = 4

    key = jax.random.PRNGKey(0)
    kx, ky = jax.random.split(key)
    # small integer-valued features so (x != y) has a mix of True/False
    x = jax.random.randint(kx, (N, C, H, W), 0, 3).astype(jnp.float32)
    y = jax.random.randint(ky, (N, C, H, W), 0, 3).astype(jnp.float32)

    ref = _reference(x, y, maxdisp, attack=False)

    # Default path: auto-selected block_h (full H here), bf16 output.
    cost = jax.block_until_ready(get_cost_volume(x, y, maxdisp))
    assert cost.shape == (N, 9, maxdisp, H, W)
    assert cost.dtype == jnp.bfloat16
    assert np.allclose(np.asarray(cost.astype(jnp.float32)), ref, atol=5e-3), \
        "mismatch (default bf16)"

    # Exact-f32 mode; explicit block_h=8 only to exercise the H-tiled grid path
    # at toy size (production callers should leave block_h to auto-selection).
    cost_f32 = jax.block_until_ready(
        get_cost_volume(x, y, maxdisp, block_h=8, out_dtype=jnp.float32))
    assert np.allclose(np.asarray(cost_f32), ref, atol=1e-6), "mismatch (f32)"

    # attack path (mean L1 instead of mismatch rate), exact f32.
    ref_a = _reference(x, y, maxdisp, attack=True)
    cost_a = jax.block_until_ready(
        get_cost_volume(x, y, maxdisp, attack=True, out_dtype=jnp.float32))
    assert np.allclose(np.asarray(cost_a), ref_a, atol=1e-5), "mismatch (attack)"

    # Non-128-aligned W exercises the lane-dense pad/crop path.
    xs, ys = x[:1, :4, :8, :96], y[:1, :4, :8, :96]
    ref_s = _reference(xs, ys, 3, attack=False)
    cost_s = jax.block_until_ready(get_cost_volume(xs, ys, 3, out_dtype=jnp.float32))
    assert np.allclose(np.asarray(cost_s), ref_s, atol=1e-6), "mismatch (padded W)"

    print("KERNEL_OK")
</pallas_src>

<mosaic_0001>
module attributes {stable_mosaic.version = 11 : i64} {
  func.func @_cost_volume_kernel(%arg0: i32, %arg1: i32, %arg2: i32, %arg3: memref<1x16x16x128xf32, #tpu.memory_space<vmem>>, %arg4: memref<1x16x16x128xf32, #tpu.memory_space<vmem>>, %arg5: memref<1x9x1x16x128xbf16, #tpu.memory_space<vmem>>) attributes {dimension_semantics = [#tpu.dimension_semantics<parallel>, #tpu.dimension_semantics<parallel>, #tpu.dimension_semantics<arbitrary>], iteration_bounds = array<i64: 2, 1, 4>, scalar_prefetch = 0 : i64, scratch_operands = 0 : i64, tpu.core_type = #tpu.core_type<tc>, window_params = [{transform_indices = @transform_0, window_bounds = array<i64: 1, 16, 16, 128>}, {transform_indices = @transform_1, window_bounds = array<i64: 1, 16, 16, 128>}, {transform_indices = @transform_2, window_bounds = array<i64: 1, 9, 1, 16, 128>}]} {
    %0 = tpu.iota {dimensions = array<i32: 1>} : vector<16x128xi32>
    %1 = vector.broadcast %arg2 : i32 to vector<16x128xi32>
    %2 = arith.cmpi sge, %0, %1 : vector<16x128xi32>
    %cst = arith.constant 0.000000e+00 : f32
    %3 = vector.broadcast %cst : f32 to vector<16x128xf32>
    %cst_0 = arith.constant 0.000000e+00 : f32
    %4 = vector.broadcast %cst_0 : f32 to vector<16x128xf32>
    %cst_1 = arith.constant 0.000000e+00 : f32
    %5 = vector.broadcast %cst_1 : f32 to vector<16x128xf32>
    %cst_2 = arith.constant 0.000000e+00 : f32
    %6 = vector.broadcast %cst_2 : f32 to vector<16x128xf32>
    %c0 = arith.constant 0 : index
    %c0_3 = arith.constant 0 : index
    %c0_4 = arith.constant 0 : index
    %c0_5 = arith.constant 0 : index
    %7 = vector.load %arg3[%c0, %c0_3, %c0_4, %c0_5] : memref<1x16x16x128xf32, #tpu.memory_space<vmem>>, vector<1x1x16x128xf32>
    %8 = vector.shape_cast %7 : vector<1x1x16x128xf32> to vector<16x128xf32>
    %c0_6 = arith.constant 0 : index
    %c0_7 = arith.constant 0 : index
    %c0_8 = arith.constant 0 : index
    %c0_9 = arith.constant 0 : index
    %9 = vector.load %arg4[%c0_6, %c0_7, %c0_8, %c0_9] : memref<1x16x16x128xf32, #tpu.memory_space<vmem>>, vector<1x1x16x128xf32>
    %10 = vector.shape_cast %9 : vector<1x1x16x128xf32> to vector<16x128xf32>
    %11 = tpu.dynamic_rotate %10 by %arg2 dim 1 : vector<16x128xf32>, i32 -> vector<16x128xf32>
    %12 = arith.cmpf one, %8, %11 : vector<16x128xf32>
    %13 = arith.extui %12 : vector<16x128xi1> to vector<16x128xi32>
    %14 = arith.sitofp %13 : vector<16x128xi32> to vector<16x128xf32>
    %15 = arith.addf %3, %14 : vector<16x128xf32>
    %c0_10 = arith.constant 0 : index
    %c1 = arith.constant 1 : index
    %c0_11 = arith.constant 0 : index
    %c0_12 = arith.constant 0 : index
    %16 = vector.load %arg3[%c0_10, %c1, %c0_11, %c0_12] : memref<1x16x16x128xf32, #tpu.memory_space<vmem>>, vector<1x1x16x128xf32>
    %17 = vector.shape_cast %16 : vector<1x1x16x128xf32> to vector<16x128xf32>
    %c0_13 = arith.constant 0 : index
    %c1_14 = arith.constant 1 : index
    %c0_15 = arith.constant 0 : index
    %c0_16 = arith.constant 0 : index
    %18 = vector.load %arg4[%c0_13, %c1_14, %c0_15, %c0_16] : memref<1x16x16x128xf32, #tpu.memory_space<vmem>>, vector<1x1x16x128xf32>
    %19 = vector.shape_cast %18 : vector<1x1x16x128xf32> to vector<16x128xf32>
    %20 = tpu.dynamic_rotate %19 by %arg2 dim 1 : vector<16x128xf32>, i32 -> vector<16x128xf32>
    %21 = arith.cmpf one, %17, %20 : vector<16x128xf32>
    %22 = arith.extui %21 : vector<16x128xi1> to vector<16x128xi32>
    %23 = arith.sitofp %22 : vector<16x128xi32> to vector<16x128xf32>
    %24 = arith.addf %4, %23 : vector<16x128xf32>
    %c0_17 = arith.constant 0 : index
    %c2 = arith.constant 2 : index
    %c0_18 = arith.constant 0 : index
    %c0_19 = arith.constant 0 : index
    %25 = vector.load %arg3[%c0_17, %c2, %c0_18, %c0_19] : memref<1x16x16x128xf32, #tpu.memory_space<vmem>>, vector<1x1x16x128xf32>
    %26 = vector.shape_cast %25 : vector<1x1x16x128xf32> to vector<16x128xf32>
    %c0_20 = arith.constant 0 : index
    %c2_21 = arith.constant 2 : index
    %c0_22 = arith.constant 0 : index
    %c0_23 = arith.constant 0 : index
    %27 = vector.load %arg4[%c0_20, %c2_21, %c0_22, %c0_23] : memref<1x16x16x128xf32, #tpu.memory_space<vmem>>, vector<1x1x16x128xf32>
    %28 = vector.shape_cast %27 : vector<1x1x16x128xf32> to vector<16x128xf32>
    %29 = tpu.dynamic_rotate %28 by %arg2 dim 1 : vector<16x128xf32>, i32 -> vector<16x128xf32>
    %30 = arith.cmpf one, %26, %29 : vector<16x128xf32>
    %31 = arith.extui %30 : vector<16x128xi1> to vector<16x128xi32>
    %32 = arith.sitofp %31 : vector<16x128xi32> to vector<16x128xf32>
    %33 = arith.addf %5, %32 : vector<16x128xf32>
    %c0_24 = arith.constant 0 : index
    %c3 = arith.constant 3 : index
    %c0_25 = arith.constant 0 : index
    %c0_26 = arith.constant 0 : index
    %34 = vector.load %arg3[%c0_24, %c3, %c0_25, %c0_26] : memref<1x16x16x128xf32, #tpu.memory_space<vmem>>, vector<1x1x16x128xf32>
    %35 = vector.shape_cast %34 : vector<1x1x16x128xf32> to vector<16x128xf32>
    %c0_27 = arith.constant 0 : index
    %c3_28 = arith.constant 3 : index
    %c0_29 = arith.constant 0 : index
    %c0_30 = arith.constant 0 : index
    %36 = vector.load %arg4[%c0_27, %c3_28, %c0_29, %c0_30] : memref<1x16x16x128xf32, #tpu.memory_space<vmem>>, vector<1x1x16x128xf32>
    %37 = vector.shape_cast %36 : vector<1x1x16x128xf32> to vector<16x128xf32>
    %38 = tpu.dynamic_rotate %37 by %arg2 dim 1 : vector<16x128xf32>, i32 -> vector<16x128xf32>
    %39 = arith.cmpf one, %35, %38 : vector<16x128xf32>
    %40 = arith.extui %39 : vector<16x128xi1> to vector<16x128xi32>
    %41 = arith.sitofp %40 : vector<16x128xi32> to vector<16x128xf32>
    %42 = arith.addf %6, %41 : vector<16x128xf32>
    %c0_31 = arith.constant 0 : index
    %c4 = arith.constant 4 : index
    %c0_32 = arith.constant 0 : index
    %c0_33 = arith.constant 0 : index
    %43 = vector.load %arg3[%c0_31, %c4, %c0_32, %c0_33] : memref<1x16x16x128xf32, #tpu.memory_space<vmem>>, vector<1x1x16x128xf32>
    %44 = vector.shape_cast %43 : vector<1x1x16x128xf32> to vector<16x128xf32>
    %c0_34 = arith.constant 0 : index
    %c4_35 = arith.constant 4 : index
    %c0_36 = arith.constant 0 : index
    %c0_37 = arith.constant 0 : index
    %45 = vector.load %arg4[%c0_34, %c4_35, %c0_36, %c0_37] : memref<1x16x16x128xf32, #tpu.memory_space<vmem>>, vector<1x1x16x128xf32>
    %46 = vector.shape_cast %45 : vector<1x1x16x128xf32> to vector<16x128xf32>
    %47 = tpu.dynamic_rotate %46 by %arg2 dim 1 : vector<16x128xf32>, i32 -> vector<16x128xf32>
    %48 = arith.cmpf one, %44, %47 : vector<16x128xf32>
    %49 = arith.extui %48 : vector<16x128xi1> to vector<16x128xi32>
    %50 = arith.sitofp %49 : vector<16x128xi32> to vector<16x128xf32>
    %51 = arith.addf %15, %50 : vector<16x128xf32>
    %c0_38 = arith.constant 0 : index
    %c5 = arith.constant 5 : index
    %c0_39 = arith.constant 0 : index
    %c0_40 = arith.constant 0 : index
    %52 = vector.load %arg3[%c0_38, %c5, %c0_39, %c0_40] : memref<1x16x16x128xf32, #tpu.memory_space<vmem>>, vector<1x1x16x128xf32>
    %53 = vector.shape_cast %52 : vector<1x1x16x128xf32> to vector<16x128xf32>
    %c0_41 = arith.constant 0 : index
    %c5_42 = arith.constant 5 : index
    %c0_43 = arith.constant 0 : index
    %c0_44 = arith.constant 0 : index
    %54 = vector.load %arg4[%c0_41, %c5_42, %c0_43, %c0_44] : memref<1x16x16x128xf32, #tpu.memory_space<vmem>>, vector<1x1x16x128xf32>
    %55 = vector.shape_cast %54 : vector<1x1x16x128xf32> to vector<16x128xf32>
    %56 = tpu.dynamic_rotate %55 by %arg2 dim 1 : vector<16x128xf32>, i32 -> vector<16x128xf32>
    %57 = arith.cmpf one, %53, %56 : vector<16x128xf32>
    %58 = arith.extui %57 : vector<16x128xi1> to vector<16x128xi32>
    %59 = arith.sitofp %58 : vector<16x128xi32> to vector<16x128xf32>
    %60 = arith.addf %24, %59 : vector<16x128xf32>
    %c0_45 = arith.constant 0 : index
    %c6 = arith.constant 6 : index
    %c0_46 = arith.constant 0 : index
    %c0_47 = arith.constant 0 : index
    %61 = vector.load %arg3[%c0_45, %c6, %c0_46, %c0_47] : memref<1x16x16x128xf32, #tpu.memory_space<vmem>>, vector<1x1x16x128xf32>
    %62 = vector.shape_cast %61 : vector<1x1x16x128xf32> to vector<16x128xf32>
    %c0_48 = arith.constant 0 : index
    %c6_49 = arith.constant 6 : index
    %c0_50 = arith.constant 0 : index
    %c0_51 = arith.constant 0 : index
    %63 = vector.load %arg4[%c0_48, %c6_49, %c0_50, %c0_51] : memref<1x16x16x128xf32, #tpu.memory_space<vmem>>, vector<1x1x16x128xf32>
    %64 = vector.shape_cast %63 : vector<1x1x16x128xf32> to vector<16x128xf32>
    %65 = tpu.dynamic_rotate %64 by %arg2 dim 1 : vector<16x128xf32>, i32 -> vector<16x128xf32>
    %66 = arith.cmpf one, %62, %65 : vector<16x128xf32>
    %67 = arith.extui %66 : vector<16x128xi1> to vector<16x128xi32>
    %68 = arith.sitofp %67 : vector<16x128xi32> to vector<16x128xf32>
    %69 = arith.addf %33, %68 : vector<16x128xf32>
    %c0_52 = arith.constant 0 : index
    %c7 = arith.constant 7 : index
    %c0_53 = arith.constant 0 : index
    %c0_54 = arith.constant 0 : index
    %70 = vector.load %arg3[%c0_52, %c7, %c0_53, %c0_54] : memref<1x16x16x128xf32, #tpu.memory_space<vmem>>, vector<1x1x16x128xf32>
    %71 = vector.shape_cast %70 : vector<1x1x16x128xf32> to vector<16x128xf32>
    %c0_55 = arith.constant 0 : index
    %c7_56 = arith.constant 7 : index
    %c0_57 = arith.constant 0 : index
    %c0_58 = arith.constant 0 : index
    %72 = vector.load %arg4[%c0_55, %c7_56, %c0_57, %c0_58] : memref<1x16x16x128xf32, #tpu.memory_space<vmem>>, vector<1x1x16x128xf32>
    %73 = vector.shape_cast %72 : vector<1x1x16x128xf32> to vector<16x128xf32>
    %74 = tpu.dynamic_rotate %73 by %arg2 dim 1 : vector<16x128xf32>, i32 -> vector<16x128xf32>
    %75 = arith.cmpf one, %71, %74 : vector<16x128xf32>
    %76 = arith.extui %75 : vector<16x128xi1> to vector<16x128xi32>
    %77 = arith.sitofp %76 : vector<16x128xi32> to vector<16x128xf32>
    %78 = arith.addf %42, %77 : vector<16x128xf32>
    %c0_59 = arith.constant 0 : index
    %c8 = arith.constant 8 : index
    %c0_60 = arith.constant 0 : index
    %c0_61 = arith.constant 0 : index
    %79 = vector.load %arg3[%c0_59, %c8, %c0_60, %c0_61] : memref<1x16x16x128xf32, #tpu.memory_space<vmem>>, vector<1x1x16x128xf32>
    %80 = vector.shape_cast %79 : vector<1x1x16x128xf32> to vector<16x128xf32>
    %c0_62 = arith.constant 0 : index
    %c8_63 = arith.constant 8 : index
    %c0_64 = arith.constant 0 : index
    %c0_65 = arith.constant 0 : index
    %81 = vector.load %arg4[%c0_62, %c8_63, %c0_64, %c0_65] : memref<1x16x16x128xf32, #tpu.memory_space<vmem>>, vector<1x1x16x128xf32>
    %82 = vector.shape_cast %81 : vector<1x1x16x128xf32> to vector<16x128xf32>
    %83 = tpu.dynamic_rotate %82 by %arg2 dim 1 : vector<16x128xf32>, i32 -> vector<16x128xf32>
    %84 = arith.cmpf one, %80, %83 : vector<16x128xf32>
    %85 = arith.extui %84 : vector<16x128xi1> to vector<16x128xi32>
    %86 = arith.sitofp %85 : vector<16x128xi32> to vector<16x128xf32>
    %87 = arith.addf %51, %86 : vector<16x128xf32>
    %88 = arith.addf %87, %60 : vector<16x128xf32>
    %89 = arith.addf %69, %78 : vector<16x128xf32>
    %90 = arith.addf %88, %89 : vector<16x128xf32>
    %cst_66 = arith.constant 0.111111112 : f32
    %91 = vector.broadcast %cst_66 : f32 to vector<16x128xf32>
    %92 = arith.mulf %90, %91 : vector<16x128xf32>
    %cst_67 = arith.constant 0.000000e+00 : f32
    %93 = vector.broadcast %cst_67 : f32 to vector<16x128xf32>
    %94 = arith.select %2, %92, %93 : vector<16x128xi1>, vector<16x128xf32>
    %95 = arith.truncf %94 : vector<16x128xf32> to vector<16x128xbf16>
    %c0_68 = arith.constant 0 : index
    %c0_69 = arith.constant 0 : index
    %c0_70 = arith.constant 0 : index
    %c0_71 = arith.constant 0 : index
    %c0_72 = arith.constant 0 : index
    %96 = vector.load %arg5[%c0_68, %c0_69, %c0_70, %c0_71, %c0_72] : memref<1x9x1x16x128xbf16, #tpu.memory_space<vmem>>, vector<1x1x1x16x128xbf16>
    %97 = vector.shape_cast %96 : vector<1x1x1x16x128xbf16> to vector<16x128xbf16>
    %98 = vector.shape_cast %95 : vector<16x128xbf16> to vector<1x1x1x16x128xbf16>
    tpu.vector_store %arg5[%c0_68, %c0_69, %c0_70, %c0_71, %c0_72], %98 {strides = array<i32>} : memref<1x9x1x16x128xbf16, #tpu.memory_space<vmem>>, vector<1x1x1x16x128xbf16>,
    %c0_73 = arith.constant 0 : index
    %c9 = arith.constant 9 : index
    %c0_74 = arith.constant 0 : index
    %c0_75 = arith.constant 0 : index
    %99 = vector.load %arg3[%c0_73, %c9, %c0_74, %c0_75] : memref<1x16x16x128xf32, #tpu.memory_space<vmem>>, vector<1x1x16x128xf32>
    %100 = vector.shape_cast %99 : vector<1x1x16x128xf32> to vector<16x128xf32>
    %c0_76 = arith.constant 0 : index
    %c9_77 = arith.constant 9 : index
    %c0_78 = arith.constant 0 : index
    %c0_79 = arith.constant 0 : index
    %101 = vector.load %arg4[%c0_76, %c9_77, %c0_78, %c0_79] : memref<1x16x16x128xf32, #tpu.memory_space<vmem>>, vector<1x1x16x128xf32>
    %102 = vector.shape_cast %101 : vector<1x1x16x128xf32> to vector<16x128xf32>
    %103 = tpu.dynamic_rotate %102 by %arg2 dim 1 : vector<16x128xf32>, i32 -> vector<16x128xf32>
    %104 = arith.cmpf one, %100, %103 : vector<16x128xf32>
    %105 = arith.extui %104 : vector<16x128xi1> to vector<16x128xi32>
    %106 = arith.sitofp %105 : vector<16x128xi32> to vector<16x128xf32>
    %107 = arith.addf %60, %106 : vector<16x128xf32>
    %c0_80 = arith.constant 0 : index
    %c10 = arith.constant 10 : index
    %c0_81 = arith.constant 0 : index
    %c0_82 = arith.constant 0 : index
    %108 = vector.load %arg3[%c0_80, %c10, %c0_81, %c0_82] : memref<1x16x16x128xf32, #tpu.memory_space<vmem>>, vector<1x1x16x128xf32>
    %109 = vector.shape_cast %108 : vector<1x1x16x128xf32> to vector<16x128xf32>
    %c0_83 = arith.constant 0 : index
    %c10_84 = arith.constant 10 : index
    %c0_85 = arith.constant 0 : index
    %c0_86 = arith.constant 0 : index
    %110 = vector.load %arg4[%c0_83, %c10_84, %c0_85, %c0_86] : memref<1x16x16x128xf32, #tpu.memory_space<vmem>>, vector<1x1x16x128xf32>
    %111 = vector.shape_cast %110 : vector<1x1x16x128xf32> to vector<16x128xf32>
    %112 = tpu.dynamic_rotate %111 by %arg2 dim 1 : vector<16x128xf32>, i32 -> vector<16x128xf32>
    %113 = arith.cmpf one, %109, %112 : vector<16x128xf32>
    %114 = arith.extui %113 : vector<16x128xi1> to vector<16x128xi32>
    %115 = arith.sitofp %114 : vector<16x128xi32> to vector<16x128xf32>
    %116 = arith.addf %69, %115 : vector<16x128xf32>
    %c0_87 = arith.constant 0 : index
    %c11 = arith.constant 11 : index
    %c0_88 = arith.constant 0 : index
    %c0_89 = arith.constant 0 : index
    %117 = vector.load %arg3[%c0_87, %c11, %c0_88, %c0_89] : memref<1x16x16x128xf32, #tpu.memory_space<vmem>>, vector<1x1x16x128xf32>
    %118 = vector.shape_cast %117 : vector<1x1x16x128xf32> to vector<16x128xf32>
    %c0_90 = arith.constant 0 : index
    %c11_91 = arith.constant 11 : index
    %c0_92 = arith.constant 0 : index
    %c0_93 = arith.constant 0 : index
    %119 = vector.load %arg4[%c0_90, %c11_91, %c0_92, %c0_93] : memref<1x16x16x128xf32, #tpu.memory_space<vmem>>, vector<1x1x16x128xf32>
    %120 = vector.shape_cast %119 : vector<1x1x16x128xf32> to vector<16x128xf32>
    %121 = tpu.dynamic_rotate %120 by %arg2 dim 1 : vector<16x128xf32>, i32 -> vector<16x128xf32>
    %122 = arith.cmpf one, %118, %121 : vector<16x128xf32>
    %123 = arith.extui %122 : vector<16x128xi1> to vector<16x128xi32>
    %124 = arith.sitofp %123 : vector<16x128xi32> to vector<16x128xf32>
    %125 = arith.addf %78, %124 : vector<16x128xf32>
    %c0_94 = arith.constant 0 : index
    %c12 = arith.constant 12 : index
    %c0_95 = arith.constant 0 : index
    %c0_96 = arith.constant 0 : index
    %126 = vector.load %arg3[%c0_94, %c12, %c0_95, %c0_96] : memref<1x16x16x128xf32, #tpu.memory_space<vmem>>, vector<1x1x16x128xf32>
    %127 = vector.shape_cast %126 : vector<1x1x16x128xf32> to vector<16x128xf32>
    %c0_97 = arith.constant 0 : index
    %c12_98 = arith.constant 12 : index
    %c0_99 = arith.constant 0 : index
    %c0_100 = arith.constant 0 : index
    %128 = vector.load %arg4[%c0_97, %c12_98, %c0_99, %c0_100] : memref<1x16x16x128xf32, #tpu.memory_space<vmem>>, vector<1x1x16x128xf32>
    %129 = vector.shape_cast %128 : vector<1x1x16x128xf32> to vector<16x128xf32>
    %130 = tpu.dynamic_rotate %129 by %arg2 dim 1 : vector<16x128xf32>, i32 -> vector<16x128xf32>
    %131 = arith.cmpf one, %127, %130 : vector<16x128xf32>
    %132 = arith.extui %131 : vector<16x128xi1> to vector<16x128xi32>
    %133 = arith.sitofp %132 : vector<16x128xi32> to vector<16x128xf32>
    %134 = arith.addf %87, %133 : vector<16x128xf32>
    %c0_101 = arith.constant 0 : index
    %c13 = arith.constant 13 : index
    %c0_102 = arith.constant 0 : index
    %c0_103 = arith.constant 0 : index
    %135 = vector.load %arg3[%c0_101, %c13, %c0_102, %c0_103] : memref<1x16x16x128xf32, #tpu.memory_space<vmem>>, vector<1x1x16x128xf32>
    %136 = vector.shape_cast %135 : vector<1x1x16x128xf32> to vector<16x128xf32>
    %c0_104 = arith.constant 0 : index
    %c13_105 = arith.constant 13 : index
    %c0_106 = arith.constant 0 : index
    %c0_107 = arith.constant 0 : index
    %137 = vector.load %arg4[%c0_104, %c13_105, %c0_106, %c0_107] : memref<1x16x16x128xf32, #tpu.memory_space<vmem>>, vector<1x1x16x128xf32>
    %138 = vector.shape_cast %137 : vector<1x1x16x128xf32> to vector<16x128xf32>
    %139 = tpu.dynamic_rotate %138 by %arg2 dim 1 : vector<16x128xf32>, i32 -> vector<16x128xf32>
    %140 = arith.cmpf one, %136, %139 : vector<16x128xf32>
    %141 = arith.extui %140 : vector<16x128xi1> to vector<16x128xi32>
    %142 = arith.sitofp %141 : vector<16x128xi32> to vector<16x128xf32>
    %143 = arith.addf %107, %142 : vector<16x128xf32>
    %c0_108 = arith.constant 0 : index
    %c14 = arith.constant 14 : index
    %c0_109 = arith.constant 0 : index
    %c0_110 = arith.constant 0 : index
    %144 = vector.load %arg3[%c0_108, %c14, %c0_109, %c0_110] : memref<1x16x16x128xf32, #tpu.memory_space<vmem>>, vector<1x1x16x128xf32>
    %145 = vector.shape_cast %144 : vector<1x1x16x128xf32> to vector<16x128xf32>
    %c0_111 = arith.constant 0 : index
    %c14_112 = arith.constant 14 : index
    %c0_113 = arith.constant 0 : index
    %c0_114 = arith.constant 0 : index
    %146 = vector.load %arg4[%c0_111, %c14_112, %c0_113, %c0_114] : memref<1x16x16x128xf32, #tpu.memory_space<vmem>>, vector<1x1x16x128xf32>
    %147 = vector.shape_cast %146 : vector<1x1x16x128xf32> to vector<16x128xf32>
    %148 = tpu.dynamic_rotate %147 by %arg2 dim 1 : vector<16x128xf32>, i32 -> vector<16x128xf32>
    %149 = arith.cmpf one, %145, %148 : vector<16x128xf32>
    %150 = arith.extui %149 : vector<16x128xi1> to vector<16x128xi32>
    %151 = arith.sitofp %150 : vector<16x128xi32> to vector<16x128xf32>
    %152 = arith.addf %116, %151 : vector<16x128xf32>
    %c0_115 = arith.constant 0 : index
    %c15 = arith.constant 15 : index
    %c0_116 = arith.constant 0 : index
    %c0_117 = arith.constant 0 : index
    %153 = vector.load %arg3[%c0_115, %c15, %c0_116, %c0_117] : memref<1x16x16x128xf32, #tpu.memory_space<vmem>>, vector<1x1x16x128xf32>
    %154 = vector.shape_cast %153 : vector<1x1x16x128xf32> to vector<16x128xf32>
    %c0_118 = arith.constant 0 : index
    %c15_119 = arith.constant 15 : index
    %c0_120 = arith.constant 0 : index
    %c0_121 = arith.constant 0 : index
    %155 = vector.load %arg4[%c0_118, %c15_119, %c0_120, %c0_121] : memref<1x16x16x128xf32, #tpu.memory_space<vmem>>, vector<1x1x16x128xf32>
    %156 = vector.shape_cast %155 : vector<1x1x16x128xf32> to vector<16x128xf32>
    %157 = tpu.dynamic_rotate %156 by %arg2 dim 1 : vector<16x128xf32>, i32 -> vector<16x128xf32>
    %158 = arith.cmpf one, %154, %157 : vector<16x128xf32>
    %159 = arith.extui %158 : vector<16x128xi1> to vector<16x128xi32>
    %160 = arith.sitofp %159 : vector<16x128xi32> to vector<16x128xf32>
    %161 = arith.addf %125, %160 : vector<16x128xf32>
    %162 = arith.addf %134, %143 : vector<16x128xf32>
    %163 = arith.addf %152, %161 : vector<16x128xf32>
    %164 = arith.addf %162, %163 : vector<16x128xf32>
    %cst_122 = arith.constant 6.250000e-02 : f32
    %165 = vector.broadcast %cst_122 : f32 to vector<16x128xf32>
    %166 = arith.mulf %164, %165 : vector<16x128xf32>
    %cst_123 = arith.constant 0.000000e+00 : f32
    %167 = vector.broadcast %cst_123 : f32 to vector<16x128xf32>
    %168 = arith.select %2, %166, %167 : vector<16x128xi1>, vector<16x128xf32>
    %169 = arith.truncf %168 : vector<16x128xf32> to vector<16x128xbf16>
    %c0_124 = arith.constant 0 : index
    %c1_125 = arith.constant 1 : index
    %c0_126 = arith.constant 0 : index
    %c0_127 = arith.constant 0 : index
    %c0_128 = arith.constant 0 : index
    %170 = vector.load %arg5[%c0_124, %c1_125, %c0_126, %c0_127, %c0_128] : memref<1x9x1x16x128xbf16, #tpu.memory_space<vmem>>, vector<1x1x1x16x128xbf16>
    %171 = vector.shape_cast %170 : vector<1x1x1x16x128xbf16> to vector<16x128xbf16>
    %172 = vector.shape_cast %169 : vector<16x128xbf16> to vector<1x1x1x16x128xbf16>
    tpu.vector_store %arg5[%c0_124, %c1_125, %c0_126, %c0_127, %c0_128], %172 {strides = array<i32>} : memref<1x9x1x16x128xbf16, #tpu.memory_space<vmem>>, vector<1x1x1x16x128xbf16>,
    %173 = arith.addf %134, %143 : vector<16x128xf32>
    %174 = arith.addf %152, %161 : vector<16x128xf32>
    %175 = arith.addf %173, %174 : vector<16x128xf32>
    %cst_129 = arith.constant 6.250000e-02 : f32
    %176 = vector.broadcast %cst_129 : f32 to vector<16x128xf32>
    %177 = arith.mulf %175, %176 : vector<16x128xf32>
    %cst_130 = arith.constant 0.000000e+00 : f32
    %178 = vector.broadcast %cst_130 : f32 to vector<16x128xf32>
    %179 = arith.select %2, %177, %178 : vector<16x128xi1>, vector<16x128xf32>
    %180 = arith.truncf %179 : vector<16x128xf32> to vector<16x128xbf16>
    %c0_131 = arith.constant 0 : index
    %c2_132 = arith.constant 2 : index
    %c0_133 = arith.constant 0 : index
    %c0_134 = arith.constant 0 : index
    %c0_135 = arith.constant 0 : index
    %181 = vector.load %arg5[%c0_131, %c2_132, %c0_133, %c0_134, %c0_135] : memref<1x9x1x16x128xbf16, #tpu.memory_space<vmem>>, vector<1x1x1x16x128xbf16>
    %182 = vector.shape_cast %181 : vector<1x1x1x16x128xbf16> to vector<16x128xbf16>
    %183 = vector.shape_cast %180 : vector<16x128xbf16> to vector<1x1x1x16x128xbf16>
    tpu.vector_store %arg5[%c0_131, %c2_132, %c0_133, %c0_134, %c0_135], %183 {strides = array<i32>} : memref<1x9x1x16x128xbf16, #tpu.memory_space<vmem>>, vector<1x1x1x16x128xbf16>,
    %184 = arith.addf %134, %143 : vector<16x128xf32>
    %185 = arith.addf %152, %161 : vector<16x128xf32>
    %186 = arith.addf %184, %185 : vector<16x128xf32>
    %cst_136 = arith.constant 6.250000e-02 : f32
    %187 = vector.broadcast %cst_136 : f32 to vector<16x128xf32>
    %188 = arith.mulf %186, %187 : vector<16x128xf32>
    %cst_137 = arith.constant 0.000000e+00 : f32
    %189 = vector.broadcast %cst_137 : f32 to vector<16x128xf32>
    %190 = arith.select %2, %188, %189 : vector<16x128xi1>, vector<16x128xf32>
    %191 = arith.truncf %190 : vector<16x128xf32> to vector<16x128xbf16>
    %c0_138 = arith.constant 0 : index
    %c3_139 = arith.constant 3 : index
    %c0_140 = arith.constant 0 : index
    %c0_141 = arith.constant 0 : index
    %c0_142 = arith.constant 0 : index
    %192 = vector.load %arg5[%c0_138, %c3_139, %c0_140, %c0_141, %c0_142] : memref<1x9x1x16x128xbf16, #tpu.memory_space<vmem>>, vector<1x1x1x16x128xbf16>
    %193 = vector.shape_cast %192 : vector<1x1x1x16x128xbf16> to vector<16x128xbf16>
    %194 = vector.shape_cast %191 : vector<16x128xbf16> to vector<1x1x1x16x128xbf16>
    tpu.vector_store %arg5[%c0_138, %c3_139, %c0_140, %c0_141, %c0_142], %194 {strides = array<i32>} : memref<1x9x1x16x128xbf16, #tpu.memory_space<vmem>>, vector<1x1x1x16x128xbf16>,
    %195 = arith.addf %134, %143 : vector<16x128xf32>
    %196 = arith.addf %152, %161 : vector<16x128xf32>
    %197 = arith.addf %195, %196 : vector<16x128xf32>
    %cst_143 = arith.constant 6.250000e-02 : f32
    %198 = vector.broadcast %cst_143 : f32 to vector<16x128xf32>
    %199 = arith.mulf %197, %198 : vector<16x128xf32>
    %cst_144 = arith.constant 0.000000e+00 : f32
    %200 = vector.broadcast %cst_144 : f32 to vector<16x128xf32>
    %201 = arith.select %2, %199, %200 : vector<16x128xi1>, vector<16x128xf32>
    %202 = arith.truncf %201 : vector<16x128xf32> to vector<16x128xbf16>
    %c0_145 = arith.constant 0 : index
    %c4_146 = arith.constant 4 : index
    %c0_147 = arith.constant 0 : index
    %c0_148 = arith.constant 0 : index
    %c0_149 = arith.constant 0 : index
    %203 = vector.load %arg5[%c0_145, %c4_146, %c0_147, %c0_148, %c0_149] : memref<1x9x1x16x128xbf16, #tpu.memory_space<vmem>>, vector<1x1x1x16x128xbf16>
    %204 = vector.shape_cast %203 : vector<1x1x1x16x128xbf16> to vector<16x128xbf16>
    %205 = vector.shape_cast %202 : vector<16x128xbf16> to vector<1x1x1x16x128xbf16>
    tpu.vector_store %arg5[%c0_145, %c4_146, %c0_147, %c0_148, %c0_149], %205 {strides = array<i32>} : memref<1x9x1x16x128xbf16, #tpu.memory_space<vmem>>, vector<1x1x1x16x128xbf16>,
    %206 = arith.addf %134, %143 : vector<16x128xf32>
    %207 = arith.addf %152, %161 : vector<16x128xf32>
    %208 = arith.addf %206, %207 : vector<16x128xf32>
    %cst_150 = arith.constant 6.250000e-02 : f32
    %209 = vector.broadcast %cst_150 : f32 to vector<16x128xf32>
    %210 = arith.mulf %208, %209 : vector<16x128xf32>
    %cst_151 = arith.constant 0.000000e+00 : f32
    %211 = vector.broadcast %cst_151 : f32 to vector<16x128xf32>
    %212 = arith.select %2, %210, %211 : vector<16x128xi1>, vector<16x128xf32>
    %213 = arith.truncf %212 : vector<16x128xf32> to vector<16x128xbf16>
    %c0_152 = arith.constant 0 : index
    %c5_153 = arith.constant 5 : index
    %c0_154 = arith.constant 0 : index
    %c0_155 = arith.constant 0 : index
    %c0_156 = arith.constant 0 : index
    %214 = vector.load %arg5[%c0_152, %c5_153, %c0_154, %c0_155, %c0_156] : memref<1x9x1x16x128xbf16, #tpu.memory_space<vmem>>, vector<1x1x1x16x128xbf16>
    %215 = vector.shape_cast %214 : vector<1x1x1x16x128xbf16> to vector<16x128xbf16>
    %216 = vector.shape_cast %213 : vector<16x128xbf16> to vector<1x1x1x16x128xbf16>
    tpu.vector_store %arg5[%c0_152, %c5_153, %c0_154, %c0_155, %c0_156], %216 {strides = array<i32>} : memref<1x9x1x16x128xbf16, #tpu.memory_space<vmem>>, vector<1x1x1x16x128xbf16>,
    %217 = arith.addf %134, %143 : vector<16x128xf32>
    %218 = arith.addf %152, %161 : vector<16x128xf32>
    %219 = arith.addf %217, %218 : vector<16x128xf32>
    %cst_157 = arith.constant 6.250000e-02 : f32
    %220 = vector.broadcast %cst_157 : f32 to vector<16x128xf32>
    %221 = arith.mulf %219, %220 : vector<16x128xf32>
    %cst_158 = arith.constant 0.000000e+00 : f32
    %222 = vector.broadcast %cst_158 : f32 to vector<16x128xf32>
    %223 = arith.select %2, %221, %222 : vector<16x128xi1>, vector<16x128xf32>
    %224 = arith.truncf %223 : vector<16x128xf32> to vector<16x128xbf16>
    %c0_159 = arith.constant 0 : index
    %c6_160 = arith.constant 6 : index
    %c0_161 = arith.constant 0 : index
    %c0_162 = arith.constant 0 : index
    %c0_163 = arith.constant 0 : index
    %225 = vector.load %arg5[%c0_159, %c6_160, %c0_161, %c0_162, %c0_163] : memref<1x9x1x16x128xbf16, #tpu.memory_space<vmem>>, vector<1x1x1x16x128xbf16>
    %226 = vector.shape_cast %225 : vector<1x1x1x16x128xbf16> to vector<16x128xbf16>
    %227 = vector.shape_cast %224 : vector<16x128xbf16> to vector<1x1x1x16x128xbf16>
    tpu.vector_store %arg5[%c0_159, %c6_160, %c0_161, %c0_162, %c0_163], %227 {strides = array<i32>} : memref<1x9x1x16x128xbf16, #tpu.memory_space<vmem>>, vector<1x1x1x16x128xbf16>,
    %228 = arith.addf %134, %143 : vector<16x128xf32>
    %229 = arith.addf %152, %161 : vector<16x128xf32>
    %230 = arith.addf %228, %229 : vector<16x128xf32>
    %cst_164 = arith.constant 6.250000e-02 : f32
    %231 = vector.broadcast %cst_164 : f32 to vector<16x128xf32>
    %232 = arith.mulf %230, %231 : vector<16x128xf32>
    %cst_165 = arith.constant 0.000000e+00 : f32
    %233 = vector.broadcast %cst_165 : f32 to vector<16x128xf32>
    %234 = arith.select %2, %232, %233 : vector<16x128xi1>, vector<16x128xf32>
    %235 = arith.truncf %234 : vector<16x128xf32> to vector<16x128xbf16>
    %c0_166 = arith.constant 0 : index
    %c7_167 = arith.constant 7 : index
    %c0_168 = arith.constant 0 : index
    %c0_169 = arith.constant 0 : index
    %c0_170 = arith.constant 0 : index
    %236 = vector.load %arg5[%c0_166, %c7_167, %c0_168, %c0_169, %c0_170] : memref<1x9x1x16x128xbf16, #tpu.memory_space<vmem>>, vector<1x1x1x16x128xbf16>
    %237 = vector.shape_cast %236 : vector<1x1x1x16x128xbf16> to vector<16x128xbf16>
    %238 = vector.shape_cast %235 : vector<16x128xbf16> to vector<1x1x1x16x128xbf16>
    tpu.vector_store %arg5[%c0_166, %c7_167, %c0_168, %c0_169, %c0_170], %238 {strides = array<i32>} : memref<1x9x1x16x128xbf16, #tpu.memory_space<vmem>>, vector<1x1x1x16x128xbf16>,
    %239 = arith.addf %134, %143 : vector<16x128xf32>
    %240 = arith.addf %152, %161 : vector<16x128xf32>
    %241 = arith.addf %239, %240 : vector<16x128xf32>
    %cst_171 = arith.constant 6.250000e-02 : f32
    %242 = vector.broadcast %cst_171 : f32 to vector<16x128xf32>
    %243 = arith.mulf %241, %242 : vector<16x128xf32>
    %cst_172 = arith.constant 0.000000e+00 : f32
    %244 = vector.broadcast %cst_172 : f32 to vector<16x128xf32>
    %245 = arith.select %2, %243, %244 : vector<16x128xi1>, vector<16x128xf32>
    %246 = arith.truncf %245 : vector<16x128xf32> to vector<16x128xbf16>
    %c0_173 = arith.constant 0 : index
    %c8_174 = arith.constant 8 : index
    %c0_175 = arith.constant 0 : index
    %c0_176 = arith.constant 0 : index
    %c0_177 = arith.constant 0 : index
    %247 = vector.load %arg5[%c0_173, %c8_174, %c0_175, %c0_176, %c0_177] : memref<1x9x1x16x128xbf16, #tpu.memory_space<vmem>>, vector<1x1x1x16x128xbf16>
    %248 = vector.shape_cast %247 : vector<1x1x1x16x128xbf16> to vector<16x128xbf16>
    %249 = vector.shape_cast %246 : vector<16x128xbf16> to vector<1x1x1x16x128xbf16>
    tpu.vector_store %arg5[%c0_173, %c8_174, %c0_175, %c0_176, %c0_177], %249 {strides = array<i32>} : memref<1x9x1x16x128xbf16, #tpu.memory_space<vmem>>, vector<1x1x1x16x128xbf16>,
    return
  }
  func.func @transform_0(%arg0: i32, %arg1: i32, %arg2: i32) -> (i32, i32, i32, i32) {
    %c0_i32 = arith.constant 0 : i32
    %c0_i32_0 = arith.constant 0 : i32
    %c0_i32_1 = arith.constant 0 : i32
    return %arg0, %c0_i32, %arg1, %c0_i32_0 : i32, i32, i32, i32
  }
  func.func @transform_1(%arg0: i32, %arg1: i32, %arg2: i32) -> (i32, i32, i32, i32) {
    %c0_i32 = arith.constant 0 : i32
    %c0_i32_0 = arith.constant 0 : i32
    %c0_i32_1 = arith.constant 0 : i32
    return %arg0, %c0_i32, %arg1, %c0_i32_0 : i32, i32, i32, i32
  }
  func.func @transform_2(%arg0: i32, %arg1: i32, %arg2: i32) -> (i32, i32, i32, i32, i32) {
    %c0_i32 = arith.constant 0 : i32
    %c0_i32_0 = arith.constant 0 : i32
    %c0_i32_1 = arith.constant 0 : i32
    return %arg0, %c0_i32, %arg2, %arg1, %c0_i32_0 : i32, i32, i32, i32, i32
  }
}

</mosaic_0001>

<bundles_post_ra>
// kernel: tpu_custom_call.1
= control target key start
LH: loop header
LB: loop body
LE: loop exit
PB: predicated region body
PF: predicated region fallthrough
CT: control target
= control target key end

     0   :  { %s1672_s0 = inlined_call_operand.hbm [shape: f32[2,16,16,128], index: 0, kind: input, shape index: {}]   ;;  %s1673_s1 = inlined_call_operand.hbm [shape: f32[2,16,16,128], index: 1, kind: input, shape index: {}]   ;;  %s1674_s2 = inlined_call_operand.hbm [shape: bf16[2,9,4,16,128], index: 2, kind: output, shape index: {}]  }
   0x1   :  { %1680 = sst [smem:[#allocation18_spill]] %s1672_s0 }
   0x2   :  { %7 = vsyncpa [#allocation3], 0 }
   0x3   :  { %9 = vsyncpa [#allocation3 + $0x1], 0 }
   0x4   :  { %10 = vsyncpa [#allocation6], 0 }
   0x5   :  { %12 = vsyncpa [#allocation6 + $0x1], 0 }
   0x6   :  { %13 = vsyncpa [#allocation4], 0 }
   0x7   :  { %15 = vsyncpa [#allocation4 + $0x1], 0  ;;  %s1248_s9 = smov 0   ;;  %s1250_s10 = smov 0  }
   0x8   :  { %s1252_s11 = smov 0   ;;  %s1254_s12 = smov 0  }
   0x9   :  { %s1256_s13 = smov 0   ;;  %s1258_s14 = smov 0  }
   0xa   :  { %s1260_s15 = smov 0   ;;  %s1262_s16 = smov 0  }
   0xb   :  { %s1264_s17 = smov 0   ;;  %s1266_s18 = smov 0  }
   0xc   :  { %s1268_s19 = smov 0  }
   0xd LB: > { %1681 = sst [smem:[#allocation13_spill]] %s1199_s14  ;;  %s752_s20 = sadd.s32 4294967295, %s1219_s19   ;;  %s1219_s19 = sphi %s1268_s19, %s21_s19   ;;  %s1215_s18 = sphi %s1266_s18, %s1707_s18   ;;  %s1211_s17 = sphi %s1264_s17, %s1699_s17   ;;  %s1207_s16 = sphi %s1262_s16, %s1706_s16   ;;  %s1203_s15 = sphi %s1260_s15, %s1698_s15   ;;  %s1199_s14 = sphi %s1258_s14, %s1697_s14   ;;  %s1195_s13 = sphi %s1256_s13, %s1705_s13   ;;  %s1191_s12 = sphi %s1254_s12, %s1704_s12   ;;  %s1187_s11 = sphi %s1252_s11, %s1703_s11   ;;  %s1183_s10 = sphi %s1250_s10, %s1702_s10   ;;  %s1179_s9 = sphi %s1248_s9, %s1701_s9  }
   0xe   : > { %1682 = sst [smem:[#allocation14_spill]] %s1211_s17  ;;  %s753_s21 = sadd.s32 4294967294, %s1219_s19  }
   0xf   : > { %s33_s22 = sadd.s32 1, %s1211_s17  ;;  %s40_s23 = sadd.s32 1, %s1215_s18 }
  0x10   : > { %p34_p0 = scmp.ge.s32.totalorder %s33_s22, 4  ;;  %s49_s24 = sadd.s32 1, %s1199_s14 }
  0x11   : > { %p56_p1 = scmp.ne.s32.totalorder %s1199_s14, %s1195_s13  ;;  %p57_p2 = scmp.eq.s32.totalorder %s1219_s19, 0 }
  0x12   : > { %s1709_s22 = smov (%p34_p0, %s33_s22), 0  ;;  %s1711_s23 = smov (!%p34_p0, %s40_s23), %s1215_s18 }
  0x13   : > { %1683 = sst [smem:[#allocation15_spill]] %s1709_s22  ;;  %p1312_p3 = por %p57_p2, %p56_p1 }
  0x14   : > { %p62_p4 = scmp.ne.s32.totalorder %s1195_s13, %s1191_s12  ;;  %p42_p5 = scmp.ge.s32.totalorder %s1711_s23, 2 }
  0x15   : > { %p63_p6 = scmp.eq.s32.totalorder %s752_s20, 0  ;;  %s101_s26 = ssub.s32 %s1211_s17, %s1709_s22 }
  0x16   : > { %s107_s27 = sadd.s32 1, %s1187_s11  ;;  %s1713_s23 = smov (%p42_p5, %s1711_s23), 0 }
  0x17   : > { %1685 = sst [smem:[#allocation16_spill]] %s1713_s23  ;;  %p1322_p7 = por %p63_p6, %p62_p4 }
  0x18   : > { %p117_p8 = scmp.ne.s32.totalorder %s1187_s11, %s1183_s10  ;;  %s44_s29 = ssub.s32 %s1215_s18, %s1713_s23 }
  0x19   : > { %p118_p9 = scmp.eq.s32.totalorder %s752_s20, 7  ;;  %p47_p10 = scmp.eq.s32.totalorder %s44_s29, 0 }
  0x1a   : > { %s102_s30 = sor.u32 %s101_s26, %s44_s29  ;;  %p123_p13 = scmp.ne.s32.totalorder %s1183_s10, %s1179_s9 }
  0x1b   : > { %p105_p11 = scmp.eq.s32.totalorder %s102_s30, 0  ;;  %p1330_p12 = por %p118_p9, %p117_p8 }
  0x1c   : > { %s1335_s4 = scalar_select %p47_p10, %s1199_s14, %s49_s24  }
  0x1d   : > { %s1338_s5 = scalar_select %p105_p11, %s1187_s11, %s107_s27  }
  0x1e   : > { %1688 = sst [smem:[#allocation17_spill]] %s1335_s4  ;;  %p124_p0 = scmp.eq.s32.totalorder %s753_s21, 7 }
  0x1f   : > { %p965_p1 = scmp.lt.s32.totalorder %s1219_s19, 8  ;;  %s1348_s7 = sand.u32 1, %s1199_s14  }
  0x20   : > { %p1343_p2 = por %p124_p0, %p123_p13  ;;  %s1676_s8 = sshll.u32 %s1348_s7, 8 }
  0x21   : > { %s881_s12 = sshll.u32 %s1215_s18, 12  ;;  %s1690_s0 = sld [smem:[#allocation18_spill]] }
  0x22   : > { %s148_s27 = scalar_lea.vmem [#allocation2], %s1676_s8  ;;  %p1361_p4 = pnand %p965_p1, %p1312_p3 }
  0x23   : > { %s157_s21 = sshll.u32 %s148_s27, 4  ;;  %p762_p5 = scmp.ge.s32.totalorder %s1219_s19, 1  ;;  %s158_s21 = int_to_ptr.vmem [resolvable:$true] %s157_s21 }
  0x24   : > { %s145_s30 = scalar_lea.sflag [#allocation3], %s1348_s7  ;;  %p1067_p6 = pneg %p1361_p4 }
  0x25   : > { %s1078_s23 = scalar_lea.vmem %s158_s21, 4096  ;;  %s1221_s20 = smov [#allocation2]  }
  0x26   : > { %p1079_p8 = scmp.ne.s32.totalorder %s158_s21, %s1078_s23  ;;  %s1083_s24 = sshll.u32 %s1221_s20, 4  ;;  %s1084_s24 = int_to_ptr.vmem [resolvable:$false] %s1083_s24 }
  0x27   : > { %s156_s26 = scalar_lea.hbm %s1690_s0, %s881_s12  ;;  %s1085_s25 = scalar_lea.vmem %s1084_s24, 8192 }
  0x28   : > { %p1081_p9 = pnand %p1079_p8, %p1067_p6  ;;  %p1086_p3 = scmp.lt.s32.totalorder %s158_s21, %s1084_s24 }
  0x29   : > { %p1087_p11 = scmp.lt.s32.totalorder %s1085_s25, %s1078_s23 }
  0x2a   : > { %p1082_p10 = pneg %p1081_p9 }
  0x2b   : > { %p1088_p13 = por %p1087_p11, %p1086_p3 }
  0x2d   : > { %p1089_p0 = pnand %p1088_p13, %p1082_p10 }
  0x2f   : > { %1092 = shalt.err (!%p1089_p0)
}
  0x30   : > { %s1222_s27 = smov 128   ;;  %s1223_s8 = smov 8  }
  0x31   : > { %957 = dma.hbm_to_vmem [thread:$0]  (!%p1361_p4), %s156_s26, 4096, %s158_s21, %s145_s30, %s1222_s27, %s1222_s27, %s1223_s8  }
  0x32   : > { %p188_p1 = scmp.lt.s32.totalorder %s1219_s19, 9  ;;  %s179_s23 = scalar_lea.hbm %s1673_s1, %s881_s12 }
  0x33   : > { %s1693_s25 = sshll.u32 %s1348_s7, 8  ;;  %s168_s4 = scalar_lea.sflag [#allocation6], %s1348_s7 }
  0x34   : > { %p1382_p8 = pnand %p762_p5, %p188_p1  ;;  %s171_s22 = scalar_lea.vmem [#allocation5], %s1693_s25 }
  0x35   : > { %s180_s17 = sshll.u32 %s171_s22, 4  ;;  %s1224_s26 = smov [#allocation5]   ;;  %s181_s17 = int_to_ptr.vmem [resolvable:$true] %s180_s17 }
  0x36   : > { %s1106_s14 = scalar_lea.vmem %s181_s17, 4096  ;;  %s1111_s21 = sshll.u32 %s1224_s26, 4  ;;  %s1112_s21 = int_to_ptr.vmem [resolvable:$false] %s1111_s21 }
  0x37   : > { %p1107_p9 = scmp.ne.s32.totalorder %s181_s17, %s1106_s14  ;;  %s1113_s0 = scalar_lea.vmem %s1112_s21, 8192 }
  0x38   : > { %p1114_p11 = scmp.lt.s32.totalorder %s181_s17, %s1112_s21  ;;  %p1115_p5 = scmp.lt.s32.totalorder %s1113_s0, %s1106_s14 }
  0x39   : > { %p1109_p10 = pnand %p1107_p9, %p1067_p6 }
  0x3a   : > { %p1116_p13 = por %p1115_p5, %p1114_p11 }
  0x3b   : > { %p1110_p3 = pneg %p1109_p10 }
  0x3d   : > { %p1117_p0 = pnand %p1116_p13, %p1110_p3 }
  0x3f   : > { %1120 = shalt.err (!%p1117_p0)
}
  0x40   : > { %960 = dma.hbm_to_vmem [thread:$0]  (!%p1361_p4), %s179_s23, 4096, %s181_s17, %s168_s4, %s1222_s27, %s1222_s27, %s1223_s8  }
  0x41   : > { %192 = sbr.rel (%p1382_p8) target bundleno = 277 (0x115), region = 28  ;;  %s194_s22 = sand.u32 (!%p1382_p8), 1, %s1195_s13  }
  0x42   : > { %s763_s7 = sshll.u32 (!%p1382_p8), %s194_s22, 8  ;;  %s195_s12 = scalar_lea.sflag (!%p1382_p8), [#allocation3], %s194_s22 }
  0x43   : > { %s1397_s30 = scalar_lea.vmem (!%p1382_p8), [#allocation2], %s763_s7 }
  0x46   : > { %1166 = dma.done.wait (%p1322_p7), %s195_s12, 4096  }
  0x47   : > { %1168 = vsyncadd (%p1322_p7), %s195_s12, 4294963200  ;;  %s204_s14 = scalar_lea.sflag [#allocation6], %s194_s22  ;;  %s1403_s20 = scalar_lea.vmem [#allocation5], %s763_s7 }
  0x48   : > { %1170 = dma.done.wait (%p1322_p7), %s204_s14, 4096  }
  0x49   : > { %1172 = vsyncadd (%p1322_p7), %s204_s14, 4294963200  ;;  %s1410_s17 = sand.u32 127, %s1203_s15   ;;  %v769_v0 = vld [vmem:[%s1403_s20 + $0x10] sm:$0xff]  ;;  %v242_v1 = vld [vmem:[%s1403_s20] sm:$0xff]  ;;  %s230_s28 = sand.u32 1, %s1183_s10   ;;  %v236_v60 = vlaneseq  ;;  %v1225_v61 = vmov 0.0  }
  0x4a   : > { %264 = vrot.lane.b32.xlu1 %v769_v0, %s1410_s17  ;;  %246 = vrot.lane.b32.xlu0 %v242_v1, %s1410_s17  ;;  %v770_v2 = vld [vmem:[%s1403_s20 + $0x18] sm:$0xff]  ;;  %v243_v3 = vld [vmem:[%s1403_s20 + $0x8] sm:$0xff]  ;;  %s940_s4 = smul.u32 72, %s230_s28  ;;  %s591_s29 = scalar_lea.sflag [#allocation4], %s230_s28 }
  0x4b   : > { %v776_v4 = vld [vmem:[%s1403_s20 + $0x28] sm:$0xff]  ;;  %v775_v5 = vld [vmem:[%s1403_s20 + $0x20] sm:$0xff]  ;;  %v782_v6 = vld [vmem:[%s1403_s20 + $0x38] sm:$0xff] }
  0x4c   : > { %v781_v7 = vld [vmem:[%s1403_s20 + $0x30] sm:$0xff]  ;;  %v788_v8 = vld [vmem:[%s1403_s20 + $0x48] sm:$0xff]  ;;  %v787_v9 = vld [vmem:[%s1403_s20 + $0x40] sm:$0xff]  ;;  %s1560_s8 = scalar_lea.vmem [#allocation7], %s940_s4 }
  0x4d   : > { %v794_v10 = vld [vmem:[%s1403_s20 + $0x58] sm:$0xff]  ;;  %v793_v11 = vld [vmem:[%s1403_s20 + $0x50] sm:$0xff]  ;;  %v800_v12 = vld [vmem:[%s1403_s20 + $0x68] sm:$0xff] }
  0x4e   : > { %266 = vrot.lane.b32.xlu1 %v770_v2, %s1410_s17  ;;  %248 = vrot.lane.b32.xlu0 %v243_v3, %s1410_s17  ;;  %v799_v13 = vld [vmem:[%s1403_s20 + $0x60] sm:$0xff]  ;;  %v806_v14 = vld [vmem:[%s1403_s20 + $0x78] sm:$0xff] }
  0x4f   : > { %v805_v15 = vld [vmem:[%s1403_s20 + $0x70] sm:$0xff]  ;;  %v812_v16 = vld [vmem:[%s1403_s20 + $0x88] sm:$0xff]  ;;  %v811_v17 = vld [vmem:[%s1403_s20 + $0x80] sm:$0xff] }
  0x50   : > { %v820_v18 = vld [vmem:[%s1403_s20 + $0x98] sm:$0xff]  ;;  %v819_v19 = vld [vmem:[%s1403_s20 + $0x90] sm:$0xff]  ;;  %v826_v20 = vld [vmem:[%s1403_s20 + $0xa8] sm:$0xff] }
  0x51   : > { %v825_v21 = vld [vmem:[%s1403_s20 + $0xa0] sm:$0xff]  ;;  %v832_v22 = vld [vmem:[%s1403_s20 + $0xb8] sm:$0xff]  ;;  %v831_v23 = vld [vmem:[%s1403_s20 + $0xb0] sm:$0xff] }
  0x52   : > { %284 = vrot.lane.b32.xlu1 %v776_v4, %s1410_s17  ;;  %282 = vrot.lane.b32.xlu0 %v775_v5, %s1410_s17  ;;  %v838_v24 = vld [vmem:[%s1403_s20 + $0xc8] sm:$0xff]  ;;  %v837_v25 = vld [vmem:[%s1403_s20 + $0xc0] sm:$0xff] }
  0x53   : > { %v844_v26 = vld [vmem:[%s1403_s20 + $0xd8] sm:$0xff]  ;;  %v843_v27 = vld [vmem:[%s1403_s20 + $0xd0] sm:$0xff]  ;;  %v850_v28 = vld [vmem:[%s1403_s20 + $0xe8] sm:$0xff] }
  0x54   : > { %v849_v29 = vld [vmem:[%s1403_s20 + $0xe0] sm:$0xff]  ;;  %v856_v30 = vld [vmem:[%s1403_s20 + $0xf8] sm:$0xff]  ;;  %v855_v31 = vld [vmem:[%s1403_s20 + $0xf0] sm:$0xff] }
  0x55   : > { %v767_v42 = vld [vmem:[%s1397_s30 + $0x10] sm:$0xff]  ;;  %v240_v43 = vld [vmem:[%s1397_s30] sm:$0xff]  ;;  %v768_v44 = vld [vmem:[%s1397_s30 + $0x18] sm:$0xff] }
  0x56   : > { %302 = vrot.lane.b32.xlu1 %v782_v6, %s1410_s17  ;;  %300 = vrot.lane.b32.xlu0 %v781_v7, %s1410_s17  ;;  %v241_v45 = vld [vmem:[%s1397_s30 + $0x8] sm:$0xff]  ;;  %v785_v49 = vld [vmem:[%s1397_s30 + $0x40] sm:$0xff] }
  0x57   : > { %v786_v48 = vld [vmem:[%s1397_s30 + $0x48] sm:$0xff]  ;;  %v773_v51 = vld [vmem:[%s1397_s30 + $0x20] sm:$0xff]  ;;  %v780_v52 = vld [vmem:[%s1397_s30 + $0x38] sm:$0xff] }
  0x58   : > { %v774_v50 = vld [vmem:[%s1397_s30 + $0x28] sm:$0xff]  ;;  %v779_v53 = vld [vmem:[%s1397_s30 + $0x30] sm:$0xff]  ;;  %v792_v54 = vld [vmem:[%s1397_s30 + $0x58] sm:$0xff] }
  0x59   : > { %v791_v57 = vld [vmem:[%s1397_s30 + $0x50] sm:$0xff]  ;;  %v798_v58 = vld [vmem:[%s1397_s30 + $0x68] sm:$0xff]  ;;  %v797_v59 = vld [vmem:[%s1397_s30 + $0x60] sm:$0xff] }
  0x5a   : > { %320 = vrot.lane.b32.xlu1 %v788_v8, %s1410_s17  ;;  %318 = vrot.lane.b32.xlu0 %v787_v9, %s1410_s17  ;;  %v804_v2 = vld [vmem:[%s1397_s30 + $0x78] sm:$0xff]  ;;  %v803_v3 = vld [vmem:[%s1397_s30 + $0x70] sm:$0xff] }
  0x5e   : > { %338 = vrot.lane.b32.xlu1 %v794_v10, %s1410_s17  ;;  %336 = vrot.lane.b32.xlu0 %v793_v11, %s1410_s17 }
  0x62   : > { %356 = vrot.lane.b32.xlu1 %v800_v12, %s1410_s17  ;;  %354 = vrot.lane.b32.xlu0 %v799_v13, %s1410_s17  ;;  %v810_v12 = vld [vmem:[%s1397_s30 + $0x88] sm:$0xff]  ;;  %v809_v13 = vld [vmem:[%s1397_s30 + $0x80] sm:$0xff] }
  0x66   : > { %374 = vrot.lane.b32.xlu1 %v806_v14, %s1410_s17  ;;  %372 = vrot.lane.b32.xlu0 %v805_v15, %s1410_s17 }
  0x6a   : > { %392 = vrot.lane.b32.xlu1 %v812_v16, %s1410_s17  ;;  %390 = vrot.lane.b32.xlu0 %v811_v17, %s1410_s17 }
  0x6e   : > { %430 = vrot.lane.b32.xlu1 %v820_v18, %s1410_s17  ;;  %428 = vrot.lane.b32.xlu0 %v819_v19, %s1410_s17 }
  0x72   : > { %448 = vrot.lane.b32.xlu1 %v826_v20, %s1410_s17  ;;  %446 = vrot.lane.b32.xlu0 %v825_v21, %s1410_s17 }
  0x76   : > { %466 = vrot.lane.b32.xlu1 %v832_v22, %s1410_s17  ;;  %464 = vrot.lane.b32.xlu0 %v831_v23, %s1410_s17 }
  0x7a   : > { %484 = vrot.lane.b32.xlu1 %v838_v24, %s1410_s17  ;;  %482 = vrot.lane.b32.xlu0 %v837_v25, %s1410_s17 }
  0x7e   : > { %502 = vrot.lane.b32.xlu1 %v844_v26, %s1410_s17  ;;  %500 = vrot.lane.b32.xlu0 %v843_v27, %s1410_s17 }
  0x82   : > { %520 = vrot.lane.b32.xlu1 %v850_v28, %s1410_s17  ;;  %518 = vrot.lane.b32.xlu0 %v849_v29, %s1410_s17 }
  0x86   : > { %538 = vrot.lane.b32.xlu1 %v856_v30, %s1410_s17  ;;  %536 = vrot.lane.b32.xlu0 %v855_v31, %s1410_s17 }
  0xbc   : > { %v265_v32 = vpop.permute.xlu1 %264  ;;  %v247_v33 = vpop.permute.xlu0 %246 }
  0xbd   : > { %vm268_vm0 = vcmp.ne.f32.partialorder %v767_v42, %v265_v32  ;;  %vm250_vm1 = vcmp.ne.f32.partialorder %v240_v43, %v247_v33 }
  0xbe   : > { %v771_v62 = vsel %vm268_vm0, 1.0, %v1225_v61  ;;  %v765_v63 = vsel %vm250_vm1, 1.0, %v1225_v61 }
  0xc0   : > { %v267_v34 = vpop.permute.xlu1 %266  ;;  %v249_v35 = vpop.permute.xlu0 %248 }
  0xc1   : > { %vm269_vm2 = vcmp.ne.f32.partialorder %v768_v44, %v267_v34  ;;  %vm251_vm3 = vcmp.ne.f32.partialorder %v241_v45, %v249_v35  ;;  %v237_v34 = vand.u32 127, %v236_v60  ;;  %v238_v35 = vstv %s1203_s15  ;;  %v830_v60 = vld [vmem:[%s1397_s30 + $0xb8] sm:$0xff] }
  0xc2   : > { %v772_v0 = vsel %vm269_vm2, 1.0, %v1225_v61  ;;  %v766_v1 = vsel %vm251_vm3, 1.0, %v1225_v61 }
  0xc3   : > { %vm1552_vm2 = vcmp.ge.s32.totalorder %v237_v34, %v238_v35 }
  0xc4   : > { %v285_v36 = vpop.permute.xlu1 %284  ;;  %v283_v37 = vpop.permute.xlu0 %282 }
  0xc5   : > { %vm287_vm6 = vcmp.ne.f32.partialorder %v774_v50, %v285_v36  ;;  %vm286_vm7 = vcmp.ne.f32.partialorder %v773_v51, %v283_v37 }
  0xc6   : > { %v778_v8 = vsel %vm287_vm6, 1.0, %v1225_v61  ;;  %v777_v9 = vsel %vm286_vm7, 1.0, %v1225_v61 }
  0xc8   : > { %v303_v38 = vpop.permute.xlu1 %302  ;;  %v301_v39 = vpop.permute.xlu0 %300 }
  0xc9   : > { %vm305_vm8 = vcmp.ne.f32.partialorder %v780_v52, %v303_v38  ;;  %vm304_vm9 = vcmp.ne.f32.partialorder %v779_v53, %v301_v39 }
  0xca   : > { %v784_v14 = vsel %vm305_vm8, 1.0, %v1225_v61  ;;  %v783_v15 = vsel %vm304_vm9, 1.0, %v1225_v61 }
  0xcc   : > { %v321_v40 = vpop.permute.xlu1 %320  ;;  %v319_v41 = vpop.permute.xlu0 %318 }
  0xcd   : > { %vm323_vm4 = vcmp.ne.f32.partialorder %v786_v48, %v321_v40  ;;  %vm322_vm5 = vcmp.ne.f32.partialorder %v785_v49, %v319_v41 }
  0xce   : > { %v790_v4 = vsel %vm323_vm4, 1.0, %v1225_v61  ;;  %v789_v5 = vsel %vm322_vm5, 1.0, %v1225_v61 }
  0xcf   : > { %v329_v18 = vadd.f32 %v790_v4, %v766_v1  ;;  %v328_v19 = vadd.f32 %v789_v5, %v765_v63  ;;  %v842_v63 = vld [vmem:[%s1397_s30 + $0xd8] sm:$0xff]  ;;  %v841_v1 = vld [vmem:[%s1397_s30 + $0xd0] sm:$0xff]  ;;  %v835_v4 = vld [vmem:[%s1397_s30 + $0xc0] sm:$0xff] }
  0xd0   : > { %v339_v46 = vpop.permute.xlu1 %338  ;;  %v337_v47 = vpop.permute.xlu0 %336  ;;  %v848_v5 = vld [vmem:[%s1397_s30 + $0xe8] sm:$0xff] }
  0xd1   : > { %vm341_vm10 = vcmp.ne.f32.partialorder %v792_v54, %v339_v46  ;;  %vm340_vm11 = vcmp.ne.f32.partialorder %v791_v57, %v337_v47  ;;  %v817_v57 = vld [vmem:[%s1397_s30 + $0x90] sm:$0xff] }
  0xd2   : > { %v796_v16 = vsel %vm341_vm10, 1.0, %v1225_v61  ;;  %v795_v17 = vsel %vm340_vm11, 1.0, %v1225_v61 }
  0xd3   : > { %v1527_v26 = vadd.f32 %v796_v16, %v772_v0  ;;  %v1529_v27 = vadd.f32 %v795_v17, %v771_v62  ;;  %v829_v62 = vld [vmem:[%s1397_s30 + $0xb0] sm:$0xff] }
  0xd4   : > { %v357_v55 = vpop.permute.xlu1 %356  ;;  %v355_v56 = vpop.permute.xlu0 %354 }
  0xd5   : > { %vm359_vm12 = vcmp.ne.f32.partialorder %v798_v58, %v357_v55  ;;  %vm358_vm13 = vcmp.ne.f32.partialorder %v797_v59, %v355_v56  ;;  %v818_v56 = vld [vmem:[%s1397_s30 + $0x98] sm:$0xff]  ;;  %v824_v58 = vld [vmem:[%s1397_s30 + $0xa8] sm:$0xff]  ;;  %v823_v59 = vld [vmem:[%s1397_s30 + $0xa0] sm:$0xff] }
  0xd6   : > { %v802_v20 = vsel %vm359_vm12, 1.0, %v1225_v61  ;;  %v801_v21 = vsel %vm358_vm13, 1.0, %v1225_v61 }
  0xd7   : > { %v1533_v30 = vadd.f32 %v802_v20, %v778_v8  ;;  %v1535_v31 = vadd.f32 %v801_v21, %v777_v9  ;;  %v853_v20 = vld [vmem:[%s1397_s30 + $0xf0] sm:$0xff] }
  0xd8   : > { %v375_v6 = vpop.permute.xlu1 %374  ;;  %v373_v7 = vpop.permute.xlu0 %372 }
  0xd9   : > { %vm377_vm14 = vcmp.ne.f32.partialorder %v804_v2, %v375_v6  ;;  %vm376_vm15 = vcmp.ne.f32.partialorder %v803_v3, %v373_v7  ;;  %v836_v3 = vld [vmem:[%s1397_s30 + $0xc8] sm:$0xff]  ;;  %v847_v6 = vld [vmem:[%s1397_s30 + $0xe0] sm:$0xff] }
  0xda   : > { %v808_v10 = vsel %vm377_vm14, 1.0, %v1225_v61  ;;  %v807_v11 = vsel %vm376_vm15, 1.0, %v1225_v61 }
  0xdb   : > { %v1523_v24 = vadd.f32 %v808_v10, %v784_v14  ;;  %v1525_v25 = vadd.f32 %v807_v11, %v783_v15 }
  0xdc   : > { %v393_v22 = vpop.permute.xlu1 %392  ;;  %v391_v23 = vpop.permute.xlu0 %390 }
  0xdd   : > { %vm395_vm0 = vcmp.ne.f32.partialorder %v810_v12, %v393_v22  ;;  %vm394_vm1 = vcmp.ne.f32.partialorder %v809_v13, %v391_v23  ;;  %v405_v38 = vadd.f32 %v1523_v24, %v1533_v30  ;;  %v404_v39 = vadd.f32 %v1525_v25, %v1535_v31 }
  0xde   : > { %v814_v28 = vsel %vm395_vm0, 1.0, %v1225_v61  ;;  %v813_v29 = vsel %vm394_vm1, 1.0, %v1225_v61 }
  0xdf   : > { %v1537_v32 = vadd.f32 %v814_v28, %v329_v18  ;;  %v1539_v33 = vadd.f32 %v813_v29, %v328_v19  ;;  %v854_v19 = vld [vmem:[%s1397_s30 + $0xf8] sm:$0xff] }
  0xe0   : > { %v431_v36 = vpop.permute.xlu1 %430  ;;  %v429_v37 = vpop.permute.xlu0 %428 }
  0xe1   : > { %v403_v40 = vadd.f32 %v1537_v32, %v1527_v26  ;;  %v402_v41 = vadd.f32 %v1539_v33, %v1529_v27  ;;  %vm433_vm3 = vcmp.ne.f32.partialorder %v818_v56, %v431_v36  ;;  %vm432_vm4 = vcmp.ne.f32.partialorder %v817_v57, %v429_v37 }
  0xe2   : > { %v822_v7 = vsel %vm433_vm3, 1.0, %v1225_v61  ;;  %v821_v8 = vsel %vm432_vm4, 1.0, %v1225_v61 }
  0xe3   : > { %v407_v42 = vadd.f32 %v405_v38, %v403_v40  ;;  %v406_v43 = vadd.f32 %v404_v39, %v402_v41  ;;  %v439_v15 = vadd.f32 %v822_v7, %v1527_v26  ;;  %v438_v16 = vadd.f32 %v821_v8, %v1529_v27 }
  0xe4   : > { %v449_v45 = vpop.permute.xlu1 %448  ;;  %v447_v46 = vpop.permute.xlu0 %446 }
  0xe5   : > { %v409_v47 = vmul.f32 0.11111111, %v407_v42  ;;  %v408_v48 = vmul.f32 0.11111111, %v406_v43  ;;  %vm451_vm5 = vcmp.ne.f32.partialorder %v824_v58, %v449_v45  ;;  %vm450_vm6 = vcmp.ne.f32.partialorder %v823_v59, %v447_v46 }
  0xe6   : > { %v828_v9 = vsel %vm451_vm5, 1.0, %v1225_v61  ;;  %v827_v10 = vsel %vm450_vm6, 1.0, %v1225_v61 }
  0xe7   : > { %v411_v49 = vsel %vm1552_vm2, %v409_v47, 0.0  ;;  %v410_v50 = vsel %vm1552_vm2, %v408_v48, 0.0  ;;  %v457_v21 = vadd.f32 %v828_v9, %v1533_v30  ;;  %v456_v22 = vadd.f32 %v827_v10, %v1535_v31 }
  0xe8   : > { %v890_v51 = vpack.c.bf16 %v411_v49, %v410_v50  ;;  %v467_v52 = vpop.permute.xlu1 %466  ;;  %v465_v53 = vpop.permute.xlu0 %464 }
  0xe9   : > { %vm469_vm7 = vcmp.ne.f32.partialorder %v830_v60, %v467_v52  ;;  %vm468_vm8 = vcmp.ne.f32.partialorder %v829_v62, %v465_v53 }
  0xea   : > { %891 = vst [vmem:[%s1560_s8] sm:$0xff] %v890_v51   ;;  %v834_v13 = vsel %vm469_vm7, 1.0, %v1225_v61  ;;  %v833_v14 = vsel %vm468_vm8, 1.0, %v1225_v61 }
  0xeb   : > { %v475_v26 = vadd.f32 %v834_v13, %v1523_v24  ;;  %v474_v27 = vadd.f32 %v833_v14, %v1525_v25 }
  0xec   : > { %v485_v54 = vpop.permute.xlu1 %484  ;;  %v483_v55 = vpop.permute.xlu0 %482 }
  0xed   : > { %vm487_vm11 = vcmp.ne.f32.partialorder %v836_v3, %v485_v54  ;;  %vm486_vm12 = vcmp.ne.f32.partialorder %v835_v4, %v483_v55 }
  0xee   : > { %v840_v23 = vsel %vm487_vm11, 1.0, %v1225_v61  ;;  %v839_v28 = vsel %vm486_vm12, 1.0, %v1225_v61 }
  0xef   : > { %v493_v31 = vadd.f32 %v840_v23, %v1537_v32  ;;  %v492_v38 = vadd.f32 %v839_v28, %v1539_v33 }
  0xf0   : > { %v503_v0 = vpop.permute.xlu1 %502  ;;  %v501_v2 = vpop.permute.xlu0 %500 }
  0xf1   : > { %vm505_vm9 = vcmp.ne.f32.partialorder %v842_v63, %v503_v0  ;;  %vm504_vm10 = vcmp.ne.f32.partialorder %v841_v1, %v501_v2 }
  0xf2   : > { %v846_v17 = vsel %vm505_vm9, 1.0, %v1225_v61  ;;  %v845_v18 = vsel %vm504_vm10, 1.0, %v1225_v61 }
  0xf3   : > { %v511_v37 = vadd.f32 %v846_v17, %v439_v15  ;;  %v510_v30 = vadd.f32 %v845_v18, %v438_v16 }
  0xf4   : > { %v521_v11 = vpop.permute.xlu1 %520  ;;  %v519_v12 = vpop.permute.xlu0 %518 }
  0xf5   : > { %vm523_vm13 = vcmp.ne.f32.partialorder %v848_v5, %v521_v11  ;;  %vm522_vm14 = vcmp.ne.f32.partialorder %v847_v6, %v519_v12  ;;  %v549_v43 = vadd.f32 %v511_v37, %v493_v31  ;;  %v548_v45 = vadd.f32 %v510_v30, %v492_v38 }
  0xf6   : > { %v852_v29 = vsel %vm523_vm13, 1.0, %v1225_v61  ;;  %v851_v34 = vsel %vm522_vm14, 1.0, %v1225_v61 }
  0xf7   : > { %v529_v25 = vadd.f32 %v852_v29, %v457_v21  ;;  %v528_v40 = vadd.f32 %v851_v34, %v456_v22 }
  0xf8   : > { %v539_v35 = vpop.permute.xlu1 %538  ;;  %v537_v36 = vpop.permute.xlu0 %536 }
  0xf9   : > { %vm541_vm15 = vcmp.ne.f32.partialorder %v854_v19, %v539_v35  ;;  %vm540_vm0 = vcmp.ne.f32.partialorder %v853_v20, %v537_v36 }
  0xfa   : > { %v858_v39 = vsel %vm541_vm15, 1.0, %v1225_v61  ;;  %v857_v24 = vsel %vm540_vm0, 1.0, %v1225_v61 }
  0xfb   : > { %v547_v41 = vadd.f32 %v858_v39, %v475_v26  ;;  %v546_v42 = vadd.f32 %v857_v24, %v474_v27 }
  0xfd   : > { %v551_v32 = vadd.f32 %v547_v41, %v529_v25  ;;  %v550_v33 = vadd.f32 %v546_v42, %v528_v40 }
  0xff   : > { %v553_v46 = vadd.f32 %v551_v32, %v549_v43  ;;  %v552_v47 = vadd.f32 %v550_v33, %v548_v45 }
 0x101   : > { %v555_v61 = vmul.f32 0.0625, %v553_v46  ;;  %v554_v48 = vmul.f32 0.0625, %v552_v47 }
 0x103   : > { %v557_v49 = vsel %vm1552_vm2, %v555_v61, 0.0  ;;  %v556_v50 = vsel %vm1552_vm2, %v554_v48, 0.0 }
 0x104   : > { %v895_v51 = vpack.c.bf16 %v557_v49, %v556_v50 }
 0x106   : > { %932 = vst [vmem:[%s1560_s8 + $0x8] sm:$0xff] %v895_v51   ;;  %933 = vst [vmem:[%s1560_s8 + $0x10] sm:$0xff] %v895_v51  }
 0x107   : > { %934 = vst [vmem:[%s1560_s8 + $0x18] sm:$0xff] %v895_v51   ;;  %935 = vst [vmem:[%s1560_s8 + $0x20] sm:$0xff] %v895_v51  }
 0x108   : > { %936 = vst [vmem:[%s1560_s8 + $0x28] sm:$0xff] %v895_v51   ;;  %937 = vst [vmem:[%s1560_s8 + $0x30] sm:$0xff] %v895_v51  }
 0x109   : > { %938 = vst [vmem:[%s1560_s8 + $0x38] sm:$0xff] %v895_v51   ;;  %939 = vst [vmem:[%s1560_s8 + $0x40] sm:$0xff] %v895_v51  }
 0x10a   : > { %s877_s27 = sshll.u32 %s1203_s15, 1  ;;  %s941_s23 = smul.u32 72, %s1207_s16 }
 0x10b   : > { %s618_s24 = sshll.u32 %s1560_s8, 4  ;;  %s1226_s21 = smov 128   ;;  %s619_s24 = int_to_ptr.vmem [resolvable:$true] %s618_s24 }
 0x10c   : > { %s605_s25 = sadd.s32 %s941_s23, %s877_s27  ;;  %946 = sst [smem:[#allocation9]] (%p1330_p12), %s1226_s21 }
 0x10d   : > { %s878_s26 = sshll.u32 %s605_s25, 6  ;;  %s1227_s12 = smov 512  }
 0x10e   : > { %s607_s7 = scalar_lea.hbm %s1674_s2, %s878_s26  ;;  %947 = sst [smem:[#allocation9 + $0x1]] (%p1330_p12), %s1227_s12 }
 0x10f   : > { %s1228_s30 = smov 2   ;;  %s1229_s15 = smov 64  }
 0x110   : > { %948 = sst [smem:[#allocation9 + $0x2]] (%p1330_p12), %s1228_s30  ;;  %s1230_s16 = smov 4  }
 0x111   : > { %949 = sst [smem:[#allocation9 + $0x3]] (%p1330_p12), %s1229_s15  ;;  %s1231_s14 = smov 131072  }
 0x112   : > { %950 = sst [smem:[#allocation9 + $0x4]] (%p1330_p12), %s1229_s15  ;;  %s1232_s20 = smov 0  }
 0x113   : > { %951 = sst [smem:[#allocation9 + $0x5]] (%p1330_p12), %s1230_s16 }
 0x114   : > { %952 = dma.general (%p1330_p12), %s619_s24, 1152, %s607_s7, %s591_s29, %s1231_s14, [#allocation9], %s1232_s20, 0  }
 0x115 PF: > { %p966_p7 = scmp.ge.s32.totalorder %s1219_s19, 2  ;;  %s646_s17 = sand.u32 1, %s1179_s9  }
 0x116   : > { %s647_s28 = scalar_lea.sflag [#allocation4], %s646_s17 }
 0x117   : > { %p962_p4 = pnand %p966_p7, %p1343_p2 }
 0x119   : > { %p963_p6 = pneg %p962_p4 }
 0x11b   : > { %1174 = dma.done.wait (%p963_p6), %s647_s28, 1152  }
 0x11c   : > { %1176 = vsyncadd (%p963_p6), %s647_s28, 4294966144  ;;  %s21_s19 = sadd.s32 1, %s1219_s19   ;;  %s1696_s3 = sld [smem:[#allocation13_spill]] }
 0x11d   : > { %p18_p1 = scmp.ge.s32.totalorder %s21_s19, 10   ;;  %s1697_s14 = sld [smem:[#allocation17_spill]] }
 0x11e   : > { %s1698_s15 = sld [smem:[#allocation14_spill]]  ;;  %s1701_s9 = smov %s1183_s10 }
 0x11f   : > { %s1699_s17 = sld [smem:[#allocation15_spill]]  ;;  %s1702_s10 = smov %s1187_s11 }
 0x120   : > { %s1700_s4 = sld [smem:[#allocation16_spill]]  ;;  %s1703_s11 = smov %s1338_s5 }
 0x121   : > { %s1704_s12 = smov %s1195_s13  ;;  %s1706_s16 = smov %s1215_s18 }
 0x122   : > { %s1705_s13 = smov %s1696_s3  ;;  %20 = sbr.rel (!%p18_p1) target bundleno = 13 (0xd), region = 129 }
 0x126   : > { %s1707_s18 = smov %s1700_s4 }
 0x127   :  { %652 = vsyncpa [#allocation3], 1 }
 0x128   :  { %654 = vsyncpa [#allocation3 + $0x1], 1 }
 0x129   :  { %655 = vsyncpa [#allocation6], 1 }
 0x12a   :  { %657 = vsyncpa [#allocation6 + $0x1], 1 }
 0x12b   :  { %658 = vsyncpa [#allocation4], 1 }
 0x12c   :  { %660 = vsyncpa [#allocation4 + $0x1], 1 }

</bundles_post_ra>
